<compile_context>
chip_gen: v7x
topology: tpu7x:2x2x1
jax: 0.10.0
libtpu: 0.0.40
codegen_flags: <defaults>
</compile_context>

<pallas_src>
import functools

import jax
import jax.numpy as jnp
import numpy as np
from jax import lax
from jax.experimental import pallas as pl
from jax.experimental.pallas import tpu as pltpu


def _round_up(x, m):
    return ((x + m - 1) // m) * m


def _balscl_kernel(row_tgt_ref, col_tgt_ref, col_cnt_ref, fa_ref, fall_ref,
                   o_ref, *, n_valid, tm):
    """One (TM, N_pad) row-tile of BalSCL.

    fa_ref   : (TM, Dp)  bf16  anchor features pre-scaled by 1/temperature
    fall_ref : (Np, Dp)  bf16  [anchors ; centers] (unscaled)
    row_tgt  : (TM, 1)   int32 (-1 for padded rows)
    col_tgt  : (1,  Np)  int32 (-2 for padded columns)
    col_cnt  : (1,  Np)  f32   batch_cls_count[class of column] (1.0 for padding)
    o_ref    : (TM, 128) f32   per-row mean_log_prob_pos, replicated across lanes
    """
    i = pl.program_id(0)

    # logits = (fa / T) @ fall^T : contraction on trailing D of both operands,
    # bf16 in / f32 accumulation on the MXU, no materialized transpose.
    logits = lax.dot_general(
        fa_ref[...], fall_ref[...],
        dimension_numbers=(((1,), (1,)), ((), ())),
        preferred_element_type=jnp.float32)                       # (TM, Np) f32

    n_pad = logits.shape[1]
    col_ids = lax.broadcasted_iota(jnp.int32, (tm, n_pad), 1)
    row_ids = lax.broadcasted_iota(jnp.int32, (tm, n_pad), 0) + i * tm

    col_valid = col_ids < n_valid                     # real (unpadded) columns
    not_diag = row_ids != col_ids                     # torch scatter(diag -> 0)
    pos = (row_tgt_ref[...] == col_tgt_ref[...]) & col_valid
    mask = (pos & not_diag).astype(jnp.float32)       # positives, self removed
    logits_mask = col_valid & not_diag                # everything except self/pad

    # Numerically-stable shift by the row max over real columns (incl. diagonal),
    # matching torch .max(dim=1); the shift cancels exactly in log_prob.
    row_max = jnp.max(jnp.where(col_valid, logits, jnp.float32(-1e30)),
                      axis=1, keepdims=True)
    logits = logits - row_max

    # per_ins_weight = batch_cls_count[class of col] - mask; divide -> recip * mul.
    inv_w = pl.reciprocal(col_cnt_ref[...] - mask, approx=True)   # (TM, Np)
    exp_logits = jnp.where(logits_mask, jnp.exp(logits), 0.0)
    denom = jnp.sum(exp_logits * inv_w, axis=1, keepdims=True)    # (TM, 1)

    log_prob = logits - jnp.log(denom)
    mean_log_prob_pos = (jnp.sum(mask * log_prob, axis=1, keepdims=True)
                         / jnp.sum(mask, axis=1, keepdims=True))  # (TM, 1)

    # Lane-dense (unmasked) store: value replicated across the 128 lanes.
    o_ref[...] = jnp.broadcast_to(mean_log_prob_pos, (tm, 128))


def balscl_loss(centers1, features, targets, cls_num_list, temperature=0.1,
                *, block_m=128, matmul_dtype=jnp.bfloat16):
    """Pallas implementation of BalSCL.forward.

    centers1: (C, D) class centers
    features: (B, 2, D) two views per sample
    targets:  (B,) int labels in [0, C)
    """
    B, n_views, D = features.shape
    assert n_views == 2
    C = len(cls_num_list)
    M = 2 * B                        # number of anchor rows
    N = M + C                        # anchors + class centers (columns)

    TM = min(block_m, _round_up(M, 8))
    M_pad = _round_up(M, TM)
    N_pad = _round_up(N, 128)
    D_pad = _round_up(D, 128)

    # ---- tiny integer / count glue (stays in plain JAX) ---------------------
    targets = targets.astype(jnp.int32)
    targets_full = jnp.concatenate(
        [targets, targets, jnp.arange(C, dtype=jnp.int32)], axis=0)          # (N,)
    batch_cls_count = jnp.zeros((C,), jnp.float32).at[targets_full].add(1.0)  # (C,)
    col_counts = batch_cls_count[targets_full]                                # (N,)

    col_tgt = jnp.full((1, N_pad), -2, jnp.int32).at[0, :N].set(targets_full)
    col_cnt = jnp.full((1, N_pad), 1.0, jnp.float32).at[0, :N].set(col_counts)
    row_tgt = jnp.full((M_pad, 1), -1, jnp.int32).at[:M, 0].set(targets_full[:M])

    # features = cat(unbind(features, dim=1)); feat_all = cat([anchors, centers])
    feat_anchor = jnp.concatenate([features[:, 0, :], features[:, 1, :]], axis=0)
    feat_all = jnp.concatenate(
        [feat_anchor, centers1.astype(feat_anchor.dtype)], axis=0)            # (N, D)

    # Fold 1/temperature into the (small) anchor operand; pad to lane-dense shapes.
    fa_pad = (jnp.zeros((M_pad, D_pad), jnp.float32)
              .at[:M, :D].set(feat_anchor.astype(jnp.float32) / temperature)
              .astype(matmul_dtype))
    fall_pad = (jnp.zeros((N_pad, D_pad), jnp.float32)
                .at[:N, :D].set(feat_all.astype(jnp.float32))
                .astype(matmul_dtype))

    grid = (M_pad // TM,)
    out = pl.pallas_call(
        functools.partial(_balscl_kernel, n_valid=N, tm=TM),
        out_shape=jax.ShapeDtypeStruct((M_pad, 128), jnp.float32),
        grid_spec=pltpu.PrefetchScalarGridSpec(
            num_scalar_prefetch=0,
            grid=grid,
            in_specs=[
                pl.BlockSpec((TM, 1), lambda i: (i, 0)),         # row targets
                pl.BlockSpec((1, N_pad), lambda i: (0, 0)),      # col targets
                pl.BlockSpec((1, N_pad), lambda i: (0, 0)),      # col class counts
                pl.BlockSpec((TM, D_pad), lambda i: (i, 0)),     # anchors (scaled)
                pl.BlockSpec((N_pad, D_pad), lambda i: (0, 0)),  # [anchors; centers]
            ],
            out_specs=pl.BlockSpec((TM, 128), lambda i: (i, 0)),
        ),
        compiler_params=pltpu.CompilerParams(
            dimension_semantics=("parallel",)),
    )(row_tgt, col_tgt, col_cnt, fa_pad, fall_pad)

    # loss.view(2, B).mean() == mean over all 2B anchors.
    return -jnp.mean(out[:M, 0])


def _balscl_reference(centers1, features, targets, cls_num_list, temperature=0.1):
    """Pure-JAX f32 reference mirroring the PyTorch code, for verification."""
    B = features.shape[0]
    C = len(cls_num_list)
    N = 2 * B + C
    targets_full = jnp.concatenate(
        [jnp.tile(targets, 2), jnp.arange(C, dtype=targets.dtype)], axis=0)
    batch_cls_count = jnp.sum(jax.nn.one_hot(targets_full, C, dtype=jnp.float32), 0)
    mask = (targets_full[:2 * B, None] == targets_full[None, :]).astype(jnp.float32)
    idx = jnp.arange(2 * B)
    logits_mask = jnp.ones((2 * B, N), jnp.float32).at[idx, idx].set(0.0)
    mask = mask * logits_mask
    feat = jnp.concatenate([features[:, 0, :], features[:, 1, :]], axis=0)
    feat = jnp.concatenate([feat, centers1], axis=0)
    logits = feat[:2 * B] @ feat.T / temperature
    logits = logits - jnp.max(logits, axis=1, keepdims=True)
    exp_logits = jnp.exp(logits) * logits_mask
    per_ins_weight = batch_cls_count[targets_full][None, :] - mask
    exp_logits_sum = jnp.sum(exp_logits / per_ins_weight, axis=1, keepdims=True)
    log_prob = logits - jnp.log(exp_logits_sum)
    mean_log_prob_pos = jnp.sum(mask * log_prob, 1) / jnp.sum(mask, 1)
    return jnp.mean(-mean_log_prob_pos)


if __name__ == "__main__":
    key = jax.random.PRNGKey(0)
    B, D, C = 8, 32, 4
    cls_num_list = [10, 20, 30, 40]          # only its length matters in forward

    k1, k2, k3 = jax.random.split(key, 3)
    features = jax.random.normal(k1, (B, 2, D), dtype=jnp.float32)
    features = features / jnp.linalg.norm(features, axis=-1, keepdims=True)
    centers1 = jax.random.normal(k2, (C, D), dtype=jnp.float32)
    centers1 = centers1 / jnp.linalg.norm(centers1, axis=-1, keepdims=True)
    targets = jax.random.randint(k3, (B,), 0, C, dtype=jnp.int32)

    loss_fn = jax.jit(
        lambda c, f, t: balscl_loss(c, f, t, cls_num_list, temperature=0.1))
    loss = jax.block_until_ready(loss_fn(centers1, features, targets))

    ref = jax.block_until_ready(
        _balscl_reference(centers1, features, targets, cls_num_list, temperature=0.1))

    # bf16 matmul operands + approx reciprocal -> slightly looser tolerance vs f32 ref.
    np.testing.assert_allclose(np.asarray(loss), np.asarray(ref),
                               rtol=2e-2, atol=2e-2)
    print("KERNEL_OK")
</pallas_src>

<mosaic_0001>
module attributes {stable_mosaic.version = 11 : i64} {
  func.func @_balscl_kernel(%arg0: i32, %arg1: memref<16x1xi32, #tpu.memory_space<vmem>>, %arg2: memref<1x128xi32, #tpu.memory_space<vmem>>, %arg3: memref<1x128xf32, #tpu.memory_space<vmem>>, %arg4: memref<16x128xbf16, #tpu.memory_space<vmem>>, %arg5: memref<128x128xbf16, #tpu.memory_space<vmem>>, %arg6: memref<16x128xf32, #tpu.memory_space<vmem>>) attributes {dimension_semantics = [#tpu.dimension_semantics<parallel>], iteration_bounds = array<i64: 1>, scalar_prefetch = 0 : i64, scratch_operands = 0 : i64, tpu.core_type = #tpu.core_type<tc>, window_params = [{transform_indices = @transform_0, window_bounds = array<i64: 16, 1>}, {pipeline_mode = #tpu.pipeline_mode<synchronous>, transform_indices = @transform_1, window_bounds = array<i64: 1, 128>}, {pipeline_mode = #tpu.pipeline_mode<synchronous>, transform_indices = @transform_2, window_bounds = array<i64: 1, 128>}, {transform_indices = @transform_3, window_bounds = array<i64: 16, 128>}, {pipeline_mode = #tpu.pipeline_mode<synchronous>, transform_indices = @transform_4, window_bounds = array<i64: 128, 128>}, {transform_indices = @transform_5, window_bounds = array<i64: 16, 128>}]} {
    %c0 = arith.constant 0 : index
    %c0_0 = arith.constant 0 : index
    %0 = vector.load %arg4[%c0, %c0_0] : memref<16x128xbf16, #tpu.memory_space<vmem>>, vector<16x128xbf16>
    %c0_1 = arith.constant 0 : index
    %c0_2 = arith.constant 0 : index
    %1 = vector.load %arg5[%c0_1, %c0_2] : memref<128x128xbf16, #tpu.memory_space<vmem>>, vector<128x128xbf16>
    %cst = arith.constant dense<0.000000e+00> : vector<16x128xf32>
    %2 = tpu.matmul %0, %1, %cst {dimension_numbers = #tpu.dot_dimension_numbers<[1], [1], [0], [0], [0, 0, 1, 0], [], []>} : vector<16x128xbf16>, vector<128x128xbf16>, vector<16x128xf32> -> vector<16x128xf32>
    %3 = tpu.iota {dimensions = array<i32: 1>} : vector<16x128xi32>
    %4 = tpu.iota {dimensions = array<i32: 0>} : vector<16x128xi32>
    %c16_i32 = arith.constant 16 : i32
    %5 = arith.muli %arg0, %c16_i32 : i32
    %6 = vector.broadcast %5 : i32 to vector<16x128xi32>
    %7 = arith.addi %4, %6 : vector<16x128xi32>
    %c20_i32 = arith.constant 20 : i32
    %8 = vector.broadcast %c20_i32 : i32 to vector<16x128xi32>
    %9 = arith.cmpi slt, %3, %8 : vector<16x128xi32>
    %10 = arith.cmpi ne, %7, %3 : vector<16x128xi32>
    %c0_3 = arith.constant 0 : index
    %c0_4 = arith.constant 0 : index
    %11 = vector.load %arg1[%c0_3, %c0_4] : memref<16x1xi32, #tpu.memory_space<vmem>>, vector<16x1xi32>
    %c0_5 = arith.constant 0 : index
    %c0_6 = arith.constant 0 : index
    %12 = vector.load %arg2[%c0_5, %c0_6] : memref<1x128xi32, #tpu.memory_space<vmem>>, vector<1x128xi32>
    %13 = vector.broadcast %11 : vector<16x1xi32> to vector<16x128xi32>
    %14 = vector.broadcast %12 : vector<1x128xi32> to vector<16x128xi32>
    %15 = arith.cmpi eq, %13, %14 : vector<16x128xi32>
    %16 = arith.andi %15, %9 : vector<16x128xi1>
    %17 = arith.andi %16, %10 : vector<16x128xi1>
    %18 = arith.extui %17 : vector<16x128xi1> to vector<16x128xi32>
    %19 = arith.sitofp %18 : vector<16x128xi32> to vector<16x128xf32>
    %20 = arith.andi %9, %10 : vector<16x128xi1>
    %cst_7 = arith.constant -1.000000e+30 : f32
    %21 = vector.broadcast %cst_7 : f32 to vector<16x128xf32>
    %22 = arith.select %9, %2, %21 : vector<16x128xi1>, vector<16x128xf32>
    %cst_8 = arith.constant dense<0xFF800000> : vector<16xf32>
    %23 = vector.multi_reduction <maximumf>, %22, %cst_8 [1] : vector<16x128xf32> to vector<16xf32>
    %24 = vector.shape_cast %23 : vector<16xf32> to vector<16x1xf32>
    %25 = vector.broadcast %24 : vector<16x1xf32> to vector<16x128xf32>
    %26 = arith.subf %2, %25 : vector<16x128xf32>
    %c0_9 = arith.constant 0 : index
    %c0_10 = arith.constant 0 : index
    %27 = vector.load %arg3[%c0_9, %c0_10] : memref<1x128xf32, #tpu.memory_space<vmem>>, vector<1x128xf32>
    %28 = vector.broadcast %27 : vector<1x128xf32> to vector<16x128xf32>
    %29 = arith.subf %28, %19 : vector<16x128xf32>
    %30 = tpu.reciprocal %29 {approx = true} : vector<16x128xf32> -> vector<16x128xf32>
    %31 = math.exp %26 : vector<16x128xf32>
    %cst_11 = arith.constant 0.000000e+00 : f32
    %32 = vector.broadcast %cst_11 : f32 to vector<16x128xf32>
    %33 = arith.select %20, %31, %32 : vector<16x128xi1>, vector<16x128xf32>
    %34 = arith.mulf %33, %30 : vector<16x128xf32>
    %cst_12 = arith.constant dense<0.000000e+00> : vector<16xf32>
    %35 = vector.multi_reduction <add>, %34, %cst_12 [1] : vector<16x128xf32> to vector<16xf32>
    %36 = vector.shape_cast %35 : vector<16xf32> to vector<16x1xf32>
    %37 = math.log %36 : vector<16x1xf32>
    %38 = vector.broadcast %37 : vector<16x1xf32> to vector<16x128xf32>
    %39 = arith.subf %26, %38 : vector<16x128xf32>
    %40 = arith.mulf %19, %39 : vector<16x128xf32>
    %cst_13 = arith.constant dense<0.000000e+00> : vector<16xf32>
    %41 = vector.multi_reduction <add>, %40, %cst_13 [1] : vector<16x128xf32> to vector<16xf32>
    %42 = vector.shape_cast %41 : vector<16xf32> to vector<16x1xf32>
    %cst_14 = arith.constant dense<0.000000e+00> : vector<16xf32>
    %43 = vector.multi_reduction <add>, %19, %cst_14 [1] : vector<16x128xf32> to vector<16xf32>
    %44 = vector.shape_cast %43 : vector<16xf32> to vector<16x1xf32>
    %45 = arith.divf %42, %44 : vector<16x1xf32>
    %46 = vector.shape_cast %45 : vector<16x1xf32> to vector<16x1xf32>
    %47 = vector.broadcast %46 : vector<16x1xf32> to vector<16x128xf32>
    %c0_15 = arith.constant 0 : index
    %c0_16 = arith.constant 0 : index
    %48 = vector.load %arg6[%c0_15, %c0_16] : memref<16x128xf32, #tpu.memory_space<vmem>>, vector<16x128xf32>
    tpu.vector_store %arg6[%c0_15, %c0_16], %47 {strides = array<i32>} : memref<16x128xf32, #tpu.memory_space<vmem>>, vector<16x128xf32>,
    return
  }
  func.func @transform_0(%arg0: i32) -> (i32, i32) {
    %c0_i32 = arith.constant 0 : i32
    %c0_i32_0 = arith.constant 0 : i32
    return %arg0, %c0_i32 : i32, i32
  }
  func.func @transform_1(%arg0: i32) -> (i32, i32) {
    %c0_i32 = arith.constant 0 : i32
    %c0_i32_0 = arith.constant 0 : i32
    %c0_i32_1 = arith.constant 0 : i32
    return %c0_i32, %c0_i32_0 : i32, i32
  }
  func.func @transform_2(%arg0: i32) -> (i32, i32) {
    %c0_i32 = arith.constant 0 : i32
    %c0_i32_0 = arith.constant 0 : i32
    %c0_i32_1 = arith.constant 0 : i32
    return %c0_i32, %c0_i32_0 : i32, i32
  }
  func.func @transform_3(%arg0: i32) -> (i32, i32) {
    %c0_i32 = arith.constant 0 : i32
    %c0_i32_0 = arith.constant 0 : i32
    return %arg0, %c0_i32 : i32, i32
  }
  func.func @transform_4(%arg0: i32) -> (i32, i32) {
    %c0_i32 = arith.constant 0 : i32
    %c0_i32_0 = arith.constant 0 : i32
    %c0_i32_1 = arith.constant 0 : i32
    return %c0_i32, %c0_i32_0 : i32, i32
  }
  func.func @transform_5(%arg0: i32) -> (i32, i32) {
    %c0_i32 = arith.constant 0 : i32
    %c0_i32_0 = arith.constant 0 : i32
    return %arg0, %c0_i32 : i32, i32
  }
}

</mosaic_0001>

<bundles_post_ra>
// kernel: _lambda_.1
= control target key start
LH: loop header
LB: loop body
LE: loop exit
PB: predicated region body
PF: predicated region fallthrough
CT: control target
= control target key end

     0   :  { %v300_v0 = vmov 0.0   ;;  %vm301_vm0 = vmmov 0   ;;  %v134_v10 = vlaneseq  ;;  %v302_v13 = vmov 0   ;;  %s411_s4 = inlined_call_operand.vmem [shape: bf16[128,128], index: 4, kind: input, shape index: {}]   ;;  %s412_s3 = inlined_call_operand.vmem [shape: bf16[16,128], index: 3, kind: input, shape index: {}]   ;;  %s413_s0 = inlined_call_operand.vmem [shape: s32[16,1], index: 0, kind: input, shape index: {}]   ;;  %s414_s1 = inlined_call_operand.vmem [shape: s32[1,128], index: 1, kind: input, shape index: {}]   ;;  %s415_s2 = inlined_call_operand.vmem [shape: f32[1,128], index: 2, kind: input, shape index: {}]   ;;  %s416_s5 = inlined_call_operand.vmem [shape: f32[16,128], index: 5, kind: output, shape index: {}]  }
   0x1   :  { %250 = vmatprep.subr.bf16.mxu0 %v300_v0  ;;  %v275_v1 = vld [vmem:[%s411_s4] sm:$0xff]   ;;  %266 = vmatprep.mubr.msk.bf16.mxu0 %vm301_vm0, %v300_v0  ;;  %v276_v2 = vld [vmem:[%s411_s4 + $0x8] sm:$0xff]   ;;  %v277_v3 = vld [vmem:[%s411_s4 + $0x10] sm:$0xff]  }
   0x2   :  { %251 = vmatpush3.bf16.xpose.msra.mxu0 %v275_v1  ;;  %v278_v4 = vld [vmem:[%s411_s4 + $0x18] sm:$0xff]   ;;  %v279_v5 = vld [vmem:[%s411_s4 + $0x20] sm:$0xff]   ;;  %v280_v6 = vld [vmem:[%s411_s4 + $0x28] sm:$0xff]   ;;  %v135_v11 = vand.u32 127, %v134_v10  ;;  %v137_v12 = vshrl.u32 %v134_v10, 7  ;;  %273 = vset.pattern.permute.xlu1 %v302_v13 }
   0x3   :  { %252 = vmatprep.subr.bf16.mxu0 %v300_v0  ;;  %v281_v7 = vld [vmem:[%s411_s4 + $0x30] sm:$0xff]   ;;  %v282_v8 = vld [vmem:[%s411_s4 + $0x38] sm:$0xff]   ;;  %v283_v9 = vld [vmem:[%s412_s3] sm:$0xff]   ;;  %274 = vset.pattern.permute.xlu0 %v302_v13 }
   0x4   :  { %v146_v14 = vld [vmem:[%s413_s0] sm:$0xff]  ;;  %vm144_vm1 = vcmp.ne.s32.totalorder %v137_v12, %v135_v11  ;;  %v147_v15 = vld [vmem:[%s413_s0 + $0x8] sm:$0xff]  ;;  %v138_v16 = vadd.s32 8, %v137_v12  ;;  %vm143_vm3 = vcmp.lt.s32.totalorder %v135_v11, 20 }
   0x5   :  { %150 = vperm.xlu1 %273, %v146_v14   ;;  %v237_v23 = vld [vmem:[%s414_s1] ss:$0 sm:$0xff]  ;;  %vm386_vm10 = vmand %vm143_vm3, %vm144_vm1 }
   0x6   :  { %vm145_vm2 = vcmp.ne.s32.totalorder %v138_v16, %v135_v11  ;;  %v240_v28 = vld [vmem:[%s415_s2] ss:$0 sm:$0xff] }
   0x7   :  { %vm392_vm11 = vmand %vm143_vm3, %vm145_vm2 }
   0x9   :  { %153 = vperm.xlu1 %273, %v147_v15  }
   0xa   :  { %253 = vmatpush3.bf16.xpose.msra.mxu0 %v276_v2 }
   0xb   :  { %254 = vmatprep.subr.bf16.mxu0 %v300_v0 }
  0x12   :  { %255 = vmatpush3.bf16.xpose.msra.mxu0 %v277_v3 }
  0x13   :  { %256 = vmatprep.subr.bf16.mxu0 %v300_v0 }
  0x1a   :  { %257 = vmatpush3.bf16.xpose.msra.mxu0 %v278_v4 }
  0x1b   :  { %258 = vmatprep.subr.bf16.mxu0 %v300_v0 }
  0x22   :  { %259 = vmatpush3.bf16.xpose.msra.mxu0 %v279_v5 }
  0x23   :  { %260 = vmatprep.subr.bf16.mxu0 %v300_v0 }
  0x2a   :  { %261 = vmatpush3.bf16.xpose.msra.mxu0 %v280_v6 }
  0x2b   :  { %262 = vmatprep.subr.bf16.mxu0 %v300_v0 }
  0x32   :  { %263 = vmatpush3.bf16.xpose.msra.mxu0 %v281_v7 }
  0x33   :  { %264 = vmatprep.subr.bf16.mxu0 %v300_v0 }
  0x3a   :  { %265 = vmatpush3.bf16.xpose.msra.mxu0 %v282_v8 }
  0x41   :  { %267 = vmatmul.mubr.bf16.vlgmr.msra.gmra.mrb[0].mxu0 %v283_v9 }
  0x84   :  { %v151_v24 = vpop.permute.xlu1 %150 }
  0x85   :  { %vm159_vm4 = vcmp.eq.s32.totalorder %v151_v24, %v237_v23 }
  0x86   :  { %vm161_vm5 = vmand %vm159_vm4, %vm143_vm3 }
  0x87   :  { %vm163_vm6 = vmand %vm161_vm5, %vm144_vm1 }
  0x88   :  { %v154_v25 = vpop.permute.xlu1 %153  ;;  %v238_v29 = vsel %vm163_vm6, 1.0, %v300_v0 }
  0x89   :  { %vm160_vm7 = vcmp.eq.s32.totalorder %v154_v25, %v237_v23  ;;  %v186_v30 = vsub.f32 %v240_v28, %v238_v29 }
  0x8a   :  { %vm162_vm8 = vmand %vm160_vm7, %vm143_vm3 }
  0x8b   :  { %vm164_vm9 = vmand %vm162_vm8, %vm145_vm2  ;;  %284 = vrcp.f32 %v186_v30 }
  0x8c   :  { %v239_v33 = vsel %vm164_vm9, 1.0, %v300_v0 }
  0x8d   :  { %v187_v37 = vsub.f32 %v240_v28, %v239_v33 }
  0x95   :  { %v285_v39 = vpop.eup %284 }
 0x114   :  { %v127_v17 = vpop.f32.mrb[0].mxu0 }
 0x115   :  { %v268_v18 = vpop.f32.mrb[1].mxu0  ;;  %v171_v19 = vsel %vm143_vm3, %v127_v17, -1e+30 }
 0x116   :  { %173 = vmax.xlane.f32.xlu0 %v171_v19  ;;  %v130_v20 = vpop.f32.mrb[2].mxu0 }
 0x117   :  { %v269_v21 = vpop.f32.mrb[3].mxu0  ;;  %v172_v22 = vsel %vm143_vm3, %v130_v20, -1e+30 }
 0x11a   :  { %175 = vmax.xlane.f32.xlu0 %v172_v22 }
 0x1a3   :  { %v174_v31 = vpop.xlane.xlu0 %173 }
 0x1a4   :  { %v177_v32 = vsub.f32 %v127_v17, %v174_v31 }
 0x1a6   :  { %v190_v34 = vmul.f32 1.442695, %v177_v32 }
 0x1a7   :  { %v176_v35 = vpop.xlane.xlu0 %175 }
 0x1a8   :  { %286 = vpow2.f32 %v190_v34  ;;  %v178_v36 = vsub.f32 %v130_v20, %v176_v35 }
 0x1aa   :  { %v192_v38 = vmul.f32 1.442695, %v178_v36 }
 0x1ac   :  { %288 = vpow2.f32 %v192_v38 }
 0x1ad   :  { %290 = vrcp.f32 %v187_v37 }
 0x1b2   :  { %v287_v40 = vpop.eup %286 }
 0x1b3   :  { %v194_v41 = vsel %vm386_vm10, %v287_v40, 0.0 }
 0x1b4   :  { %v196_v42 = vmul.f32 %v285_v39, %v194_v41 }
 0x1b6   :  { %v289_v43 = vpop.eup %288  ;;  %198 = vadd.xlane.f32.xlu0 %v196_v42 }
 0x1b7   :  { %v291_v44 = vpop.eup %290  ;;  %v195_v45 = vsel %vm392_vm11, %v289_v43, 0.0 }
 0x1b8   :  { %v197_v46 = vmul.f32 %v291_v44, %v195_v45 }
 0x1ba   :  { %214 = vadd.xlane.f32.xlu0 %v238_v29  ;;  %200 = vadd.xlane.f32.xlu1 %v197_v46 }
 0x1be   :  { %216 = vadd.xlane.f32.xlu0 %v239_v33 }
 0x243   :  { %v199_v47 = vpop.xlane.xlu0 %198 }
 0x244   :  { %292 = vlog2.f32 %v199_v47 }
 0x247   :  { %v201_v48 = vpop.xlane.xlu1 %200  ;;  %v215_v57 = vpop.xlane.xlu0 %214 }
 0x248   :  { %294 = vlog2.f32 %v201_v48 }
 0x249   :  { %296 = vrcp.f32 %v215_v57 }
 0x24b   :  { %v217_v58 = vpop.xlane.xlu0 %216 }
 0x24c   :  { %298 = vrcp.f32 %v217_v58 }
 0x24e   :  { %v293_v49 = vpop.eup %292 }
 0x24f   :  { %v203_v50 = vmul.f32 0.6931472, %v293_v49 }
 0x251   :  { %v206_v51 = vsub.f32 %v177_v32, %v203_v50 }
 0x252   :  { %v295_v52 = vpop.eup %294 }
 0x253   :  { %v208_v53 = vmul.f32 %v238_v29, %v206_v51  ;;  %v205_v54 = vmul.f32 0.6931472, %v295_v52  ;;  %v297_v59 = vpop.eup %296 }
 0x255   :  { %210 = vadd.xlane.f32.xlu0 %v208_v53  ;;  %v207_v55 = vsub.f32 %v178_v36, %v205_v54 }
 0x256   :  { %v299_v62 = vpop.eup %298 }
 0x257   :  { %v209_v56 = vmul.f32 %v239_v33, %v207_v55 }
 0x259   :  { %212 = vadd.xlane.f32.xlu0 %v209_v56 }
 0x2e2   :  { %v211_v60 = vpop.xlane.xlu0 %210 }
 0x2e3   :  { %v219_v61 = vmul.f32 %v297_v59, %v211_v60 }
 0x2e5   :  { %222 = vst [vmem:[%s416_s5] sm:$0xff] %v219_v61 }
 0x2e6   :  { %v213_v63 = vpop.xlane.xlu0 %212 }
 0x2e7   :  { %v221_v0 = vmul.f32 %v299_v62, %v213_v63 }
 0x2e9   :  { %223 = vst [vmem:[%s416_s5 + $0x8] sm:$0xff] %v221_v0 }

</bundles_post_ra>
